<compile_context>
chip_gen: v6e
topology: v6e:2x2x1
jax: 0.10.0
libtpu: 0.0.40
codegen_flags: <defaults>
</compile_context>

<pallas_src>
import functools

import jax
import jax.numpy as jnp
from jax import lax
from jax.experimental import pallas as pl
from jax.experimental.pallas import tpu as pltpu

_TEMP = 0.05
_EPS = 1e-12          # F.normalize default: x / max(||x||, eps)
_EPS2 = _EPS * _EPS   # clamp on the sum of squares (rsqrt formulation)


def _cosine_kernel(img_ref, con_ref, out_ref,
                   acc_ref, img_ssq_ref, con_ssq_ref, *, inv_temp):
    k = pl.program_id(2)

    @pl.when(k == 0)
    def _init():
        acc_ref[...] = jnp.zeros_like(acc_ref)
        img_ssq_ref[...] = jnp.zeros_like(img_ssq_ref)
        con_ssq_ref[...] = jnp.zeros_like(con_ssq_ref)

    img = img_ref[...]
    con = con_ref[...]

    # Un-normalized matmul on the MXU, contracting the last dim of both
    # operands directly (no transpose of `concept`).
    acc_ref[...] += lax.dot_general(
        img, con,
        dimension_numbers=(((1,), (1,)), ((), ())),
        preferred_element_type=jnp.float32)

    # Partial sums of squares for this K slab (f32 on the VPU).
    img_f32 = img.astype(jnp.float32)
    con_f32 = con.astype(jnp.float32)
    img_ssq_ref[...] += jnp.sum(img_f32 * img_f32, axis=-1, keepdims=True)

    # Accumulate ||concept_row||^2 in lane-major (8, TN) layout via a small
    # ones matmul (all 8 rows identical); avoids a sublane->lane relayout at
    # finalize time.  Extra MXU work is 8/TM of the main matmul -> negligible.
    ones_rows = jnp.ones((8, con.shape[1]), jnp.float32)
    con_ssq_ref[...] += lax.dot_general(
        ones_rows, con_f32 * con_f32,
        dimension_numbers=(((1,), (1,)), ((), ())),
        preferred_element_type=jnp.float32)

    @pl.when(k == pl.num_programs(2) - 1)
    def _finalize():
        inv_img = lax.rsqrt(jnp.maximum(img_ssq_ref[...], _EPS2))   # (TM, 1)
        inv_con = lax.rsqrt(jnp.maximum(con_ssq_ref[0:1, :], _EPS2))  # (1, TN)
        out = acc_ref[...] * (inv_img * inv_temp) * inv_con
        out_ref[...] = out.astype(out_ref.dtype)


def _round_up(x, m):
    return ((x + m - 1) // m) * m


@functools.partial(jax.jit, static_argnames=("temp", "scale"))
def cosine_classifier(img, concept, *, temp=_TEMP, scale=True):
    """img: (bs, emb_dim), concept: (n_class, emb_dim) -> (bs, n_class)."""
    bs, emb_dim = img.shape
    n_class, emb_dim2 = concept.shape
    assert emb_dim == emb_dim2

    out_dtype = jnp.result_type(img.dtype, concept.dtype)

    # Tile sizes.  Prefer a single lane-dense tile along N / a single K step
    # when the problem is small enough (fewer grid steps, fewer accumulator
    # RMWs, less padding waste); otherwise fall back to 256/512 defaults.
    # With double buffering even the largest combo (256x1024 in-blocks) is a
    # few MiB of VMEM, well inside v7x's 64 MiB.
    tm = 256 if bs > 256 else _round_up(bs, 8)

    n128 = _round_up(n_class, 128)
    tn = n128 if n128 <= 512 else 256

    k128 = _round_up(emb_dim, 128)
    tk = k128 if k128 <= 1024 else 512

    bs_p = _round_up(bs, tm)
    nc_p = _round_up(n_class, tn)
    k_p = _round_up(emb_dim, tk)

    # Zero padding: padded rows/cols have zero dot products (and their norms
    # are clamped by eps, so 0 * 1/eps = 0), and are sliced off below.
    if (bs_p, k_p) != (bs, emb_dim):
        img = jnp.pad(img, ((0, bs_p - bs), (0, k_p - emb_dim)))
    if (nc_p, k_p) != (n_class, emb_dim):
        concept = jnp.pad(concept, ((0, nc_p - n_class), (0, k_p - emb_dim)))

    grid = (bs_p // tm, nc_p // tn, k_p // tk)
    inv_temp = (1.0 / temp) if scale else 1.0
    kernel = functools.partial(_cosine_kernel, inv_temp=inv_temp)

    itemsize = jnp.dtype(img.dtype).itemsize
    cost = pl.CostEstimate(
        flops=2 * bs * n_class * emb_dim,
        transcendentals=bs + n_class,
        bytes_accessed=itemsize * (bs * emb_dim + n_class * emb_dim)
        + jnp.dtype(out_dtype).itemsize * bs * n_class,
    )

    out = pl.pallas_call(
        kernel,
        out_shape=jax.ShapeDtypeStruct((bs_p, nc_p), out_dtype),
        grid_spec=pltpu.PrefetchScalarGridSpec(
            num_scalar_prefetch=0,
            grid=grid,
            in_specs=[
                pl.BlockSpec((tm, tk), lambda i, j, k: (i, k)),
                pl.BlockSpec((tn, tk), lambda i, j, k: (j, k)),
            ],
            out_specs=pl.BlockSpec((tm, tn), lambda i, j, k: (i, j)),
            scratch_shapes=[
                pltpu.VMEM((tm, tn), jnp.float32),   # matmul accumulator
                pltpu.VMEM((tm, 1), jnp.float32),    # per-row ||img||^2
                pltpu.VMEM((8, tn), jnp.float32),    # per-class ||concept||^2
            ],
        ),
        compiler_params=pltpu.CompilerParams(
            dimension_semantics=("parallel", "parallel", "arbitrary"),
            vmem_limit_bytes=32 * 1024 * 1024,
        ),
        cost_estimate=cost,
    )(img, concept)

    return out[:bs, :n_class]


def _reference(img, concept, temp=_TEMP, scale=True):
    img_n = img / jnp.maximum(
        jnp.linalg.norm(img, axis=-1, keepdims=True), _EPS)
    con_n = concept / jnp.maximum(
        jnp.linalg.norm(concept, axis=-1, keepdims=True), _EPS)
    pred = img_n @ con_n.T
    return pred / temp if scale else pred


if __name__ == "__main__":
    key = jax.random.PRNGKey(0)
    k1, k2, k3, k4, k5, k6 = jax.random.split(key, 6)

    # 1) Small shapes consistent with the module (single tile, no padding).
    bs, n_class, emb_dim = 8, 16, 128
    img = jax.random.normal(k1, (bs, emb_dim), dtype=jnp.float32)
    concept = jax.random.normal(k2, (n_class, emb_dim), dtype=jnp.float32)
    out = jax.block_until_ready(cosine_classifier(img, concept))
    ref = _reference(img, concept)
    assert out.shape == (bs, n_class)
    assert jnp.allclose(out, ref, atol=1e-4, rtol=1e-4), "mismatch vs reference"

    # 2) Non-multiple-of-128 dims -> padded, single-block fast path.
    bs2, n_class2, emb_dim2 = 16, 300, 1000
    img2 = jax.random.normal(k3, (bs2, emb_dim2), dtype=jnp.float32)
    concept2 = jax.random.normal(k4, (n_class2, emb_dim2), dtype=jnp.float32)
    out2 = jax.block_until_ready(cosine_classifier(img2, concept2))
    ref2 = _reference(img2, concept2)
    assert out2.shape == (bs2, n_class2)
    assert jnp.allclose(out2, ref2, atol=1e-4, rtol=1e-4), "mismatch (padded)"

    # 3) Larger n_class / emb_dim -> exercises multi-block N and the K
    #    accumulation loop (grid = (1, 3, 3)), plus scale=False.
    bs3, n_class3, emb_dim3 = 40, 600, 1100
    img3 = jax.random.normal(k5, (bs3, emb_dim3), dtype=jnp.float32)
    concept3 = jax.random.normal(k6, (n_class3, emb_dim3), dtype=jnp.float32)
    out3 = jax.block_until_ready(cosine_classifier(img3, concept3, scale=False))
    ref3 = _reference(img3, concept3, scale=False)
    assert out3.shape == (bs3, n_class3)
    assert jnp.allclose(out3, ref3, atol=1e-4, rtol=1e-4), "mismatch (tiled)"

    print("KERNEL_OK")
</pallas_src>

<mosaic_0001>
module attributes {stable_mosaic.version = 11 : i64} {
  func.func @_cosine_kernel(%arg0: i32, %arg1: i32, %arg2: i32, %arg3: memref<8x128xf32, #tpu.memory_space<vmem>>, %arg4: memref<128x128xf32, #tpu.memory_space<vmem>>, %arg5: memref<8x128xf32, #tpu.memory_space<vmem>>, %arg6: memref<8x128xf32, #tpu.memory_space<vmem>>, %arg7: memref<8x1xf32, #tpu.memory_space<vmem>>, %arg8: memref<8x128xf32, #tpu.memory_space<vmem>>) attributes {dimension_semantics = [#tpu.dimension_semantics<parallel>, #tpu.dimension_semantics<parallel>, #tpu.dimension_semantics<arbitrary>], iteration_bounds = array<i64: 1, 1, 1>, scalar_prefetch = 0 : i64, scratch_operands = 3 : i64, tpu.core_type = #tpu.core_type<tc>, window_params = [{transform_indices = @transform_0, window_bounds = array<i64: 8, 128>}, {transform_indices = @transform_1, window_bounds = array<i64: 128, 128>}, {transform_indices = @transform_2, window_bounds = array<i64: 8, 128>}]} {
    %c0_i32 = arith.constant 0 : i32
    %0 = arith.cmpi eq, %arg2, %c0_i32 : i32
    %1 = arith.extui %0 : i1 to i32
    %c0_i32_0 = arith.constant 0 : i32
    %2 = arith.cmpi ne, %1, %c0_i32_0 : i32
    scf.if %2 {
      %cst_21 = arith.constant 0.000000e+00 : f32
      %24 = vector.broadcast %cst_21 : f32 to vector<8x128xf32>
      %c0_22 = arith.constant 0 : index
      %c0_23 = arith.constant 0 : index
      %25 = vector.load %arg6[%c0_22, %c0_23] : memref<8x128xf32, #tpu.memory_space<vmem>>, vector<8x128xf32>
      tpu.vector_store %arg6[%c0_22, %c0_23], %24 {strides = array<i32>} : memref<8x128xf32, #tpu.memory_space<vmem>>, vector<8x128xf32>,
      %cst_24 = arith.constant 0.000000e+00 : f32
      %26 = vector.broadcast %cst_24 : f32 to vector<8x1xf32>
      %c0_25 = arith.constant 0 : index
      %c0_26 = arith.constant 0 : index
      %27 = vector.load %arg7[%c0_25, %c0_26] : memref<8x1xf32, #tpu.memory_space<vmem>>, vector<8x1xf32>
      tpu.vector_store %arg7[%c0_25, %c0_26], %26 {strides = array<i32>} : memref<8x1xf32, #tpu.memory_space<vmem>>, vector<8x1xf32>,
      %cst_27 = arith.constant 0.000000e+00 : f32
      %28 = vector.broadcast %cst_27 : f32 to vector<8x128xf32>
      %c0_28 = arith.constant 0 : index
      %c0_29 = arith.constant 0 : index
      %29 = vector.load %arg8[%c0_28, %c0_29] : memref<8x128xf32, #tpu.memory_space<vmem>>, vector<8x128xf32>
      tpu.vector_store %arg8[%c0_28, %c0_29], %28 {strides = array<i32>} : memref<8x128xf32, #tpu.memory_space<vmem>>, vector<8x128xf32>,
    } else {
    }
    %c0 = arith.constant 0 : index
    %c0_1 = arith.constant 0 : index
    %3 = vector.load %arg3[%c0, %c0_1] : memref<8x128xf32, #tpu.memory_space<vmem>>, vector<8x128xf32>
    %c0_2 = arith.constant 0 : index
    %c0_3 = arith.constant 0 : index
    %4 = vector.load %arg4[%c0_2, %c0_3] : memref<128x128xf32, #tpu.memory_space<vmem>>, vector<128x128xf32>
    %c0_4 = arith.constant 0 : index
    %c0_5 = arith.constant 0 : index
    %5 = vector.load %arg6[%c0_4, %c0_5] : memref<8x128xf32, #tpu.memory_space<vmem>>, vector<8x128xf32>
    %cst = arith.constant dense<0.000000e+00> : vector<8x128xf32>
    %6 = tpu.matmul %3, %4, %cst {dimension_numbers = #tpu.dot_dimension_numbers<[1], [1], [0], [0], [0, 0, 1, 0], [], []>} : vector<8x128xf32>, vector<128x128xf32>, vector<8x128xf32> -> vector<8x128xf32>
    %7 = arith.addf %5, %6 : vector<8x128xf32>
    %c0_6 = arith.constant 0 : index
    %c0_7 = arith.constant 0 : index
    %8 = vector.load %arg6[%c0_6, %c0_7] : memref<8x128xf32, #tpu.memory_space<vmem>>, vector<8x128xf32>
    tpu.vector_store %arg6[%c0_6, %c0_7], %7 {strides = array<i32>} : memref<8x128xf32, #tpu.memory_space<vmem>>, vector<8x128xf32>,
    %c0_8 = arith.constant 0 : index
    %c0_9 = arith.constant 0 : index
    %9 = vector.load %arg7[%c0_8, %c0_9] : memref<8x1xf32, #tpu.memory_space<vmem>>, vector<8x1xf32>
    %10 = arith.mulf %3, %3 : vector<8x128xf32>
    %cst_10 = arith.constant dense<0.000000e+00> : vector<8xf32>
    %11 = vector.multi_reduction <add>, %10, %cst_10 [1] : vector<8x128xf32> to vector<8xf32>
    %12 = vector.shape_cast %11 : vector<8xf32> to vector<8x1xf32>
    %13 = arith.addf %9, %12 : vector<8x1xf32>
    %c0_11 = arith.constant 0 : index
    %c0_12 = arith.constant 0 : index
    %14 = vector.load %arg7[%c0_11, %c0_12] : memref<8x1xf32, #tpu.memory_space<vmem>>, vector<8x1xf32>
    tpu.vector_store %arg7[%c0_11, %c0_12], %13 {strides = array<i32>} : memref<8x1xf32, #tpu.memory_space<vmem>>, vector<8x1xf32>,
    %cst_13 = arith.constant 1.000000e+00 : f32
    %15 = vector.broadcast %cst_13 : f32 to vector<8x128xf32>
    %c0_14 = arith.constant 0 : index
    %c0_15 = arith.constant 0 : index
    %16 = vector.load %arg8[%c0_14, %c0_15] : memref<8x128xf32, #tpu.memory_space<vmem>>, vector<8x128xf32>
    %17 = arith.mulf %4, %4 : vector<128x128xf32>
    %cst_16 = arith.constant dense<0.000000e+00> : vector<8x128xf32>
    %18 = tpu.matmul %15, %17, %cst_16 {dimension_numbers = #tpu.dot_dimension_numbers<[1], [1], [0], [0], [0, 0, 1, 0], [], []>} : vector<8x128xf32>, vector<128x128xf32>, vector<8x128xf32> -> vector<8x128xf32>
    %19 = arith.addf %16, %18 : vector<8x128xf32>
    %c0_17 = arith.constant 0 : index
    %c0_18 = arith.constant 0 : index
    %20 = vector.load %arg8[%c0_17, %c0_18] : memref<8x128xf32, #tpu.memory_space<vmem>>, vector<8x128xf32>
    tpu.vector_store %arg8[%c0_17, %c0_18], %19 {strides = array<i32>} : memref<8x128xf32, #tpu.memory_space<vmem>>, vector<8x128xf32>,
    %c0_i32_19 = arith.constant 0 : i32
    %21 = arith.cmpi eq, %arg2, %c0_i32_19 : i32
    %22 = arith.extui %21 : i1 to i32
    %c0_i32_20 = arith.constant 0 : i32
    %23 = arith.cmpi ne, %22, %c0_i32_20 : i32
    scf.if %23 {
      %c0_21 = arith.constant 0 : index
      %c0_22 = arith.constant 0 : index
      %24 = vector.load %arg7[%c0_21, %c0_22] : memref<8x1xf32, #tpu.memory_space<vmem>>, vector<8x1xf32>
      %cst_23 = arith.constant 1.000000e-24 : f32
      %25 = vector.broadcast %cst_23 : f32 to vector<8x1xf32>
      %26 = arith.maximumf %24, %25 : vector<8x1xf32>
      %27 = math.rsqrt %26 : vector<8x1xf32>
      %c0_24 = arith.constant 0 : index
      %c0_25 = arith.constant 0 : index
      %28 = vector.load %arg8[%c0_24, %c0_25] : memref<8x128xf32, #tpu.memory_space<vmem>>, vector<1x128xf32>
      %cst_26 = arith.constant 1.000000e-24 : f32
      %29 = vector.broadcast %cst_26 : f32 to vector<1x128xf32>
      %30 = arith.maximumf %28, %29 : vector<1x128xf32>
      %31 = math.rsqrt %30 : vector<1x128xf32>
      %c0_27 = arith.constant 0 : index
      %c0_28 = arith.constant 0 : index
      %32 = vector.load %arg6[%c0_27, %c0_28] : memref<8x128xf32, #tpu.memory_space<vmem>>, vector<8x128xf32>
      %cst_29 = arith.constant 2.000000e+01 : f32
      %33 = vector.broadcast %cst_29 : f32 to vector<8x1xf32>
      %34 = arith.mulf %27, %33 : vector<8x1xf32>
      %35 = vector.broadcast %34 : vector<8x1xf32> to vector<8x128xf32>
      %36 = arith.mulf %32, %35 : vector<8x128xf32>
      %37 = vector.broadcast %31 : vector<1x128xf32> to vector<8x128xf32>
      %38 = arith.mulf %36, %37 : vector<8x128xf32>
      %c0_30 = arith.constant 0 : index
      %c0_31 = arith.constant 0 : index
      %39 = vector.load %arg5[%c0_30, %c0_31] : memref<8x128xf32, #tpu.memory_space<vmem>>, vector<8x128xf32>
      tpu.vector_store %arg5[%c0_30, %c0_31], %38 {strides = array<i32>} : memref<8x128xf32, #tpu.memory_space<vmem>>, vector<8x128xf32>,
    } else {
    }
    return
  }
  func.func @transform_0(%arg0: i32, %arg1: i32, %arg2: i32) -> (i32, i32) {
    %c0_i32 = arith.constant 0 : i32
    return %arg0, %arg2 : i32, i32
  }
  func.func @transform_1(%arg0: i32, %arg1: i32, %arg2: i32) -> (i32, i32) {
    %c0_i32 = arith.constant 0 : i32
    return %arg1, %arg2 : i32, i32
  }
  func.func @transform_2(%arg0: i32, %arg1: i32, %arg2: i32) -> (i32, i32) {
    %c0_i32 = arith.constant 0 : i32
    return %arg0, %arg1 : i32, i32
  }
}

</mosaic_0001>

<bundles_post_ra>
// kernel: cosine_classifier.1
= control target key start
LH: loop header
LB: loop body
LE: loop exit
PB: predicated region body
PF: predicated region fallthrough
CT: control target
= control target key end

     0   :  { %v379_v4 = vmov 0.0   ;;  %vm380_vm0 = vmmov 0   ;;  %vm17_vm1 = vcmask 7168   ;;  %s495_s0 = inlined_call_operand.vmem [shape: f32[8,128], index: 0, kind: input, shape index: {}]   ;;  %s496_s1 = inlined_call_operand.vmem [shape: f32[128,128], index: 1, kind: input, shape index: {}]   ;;  %s497_s2 = inlined_call_operand.hbm [shape: f32[8,128], index: 2, kind: output, shape index: {}]  }
   0x1   :  { %v402_v0 = vld [vmem:[%s495_s0] sm:$0xff]  ;;  %v36_v1 = vld [vmem:[%s496_s1 + $0x78] sm:$0xff]  ;;  %v35_v2 = vld [vmem:[%s496_s1 + $0x70] sm:$0xff]  ;;  %312 = vmatprep.subr.mxu1 %v379_v4  ;;  %277 = vmatprep.subr.mxu0 %v379_v4  ;;  %18 = vst.msk [vmem:[#allocation3] sm:$0xff] %vm17_vm1, %v379_v4 }
   0x2   :  { %v111_v3 = vmul.f32 %v402_v0, %v402_v0  ;;  %v133_v5 = vmul.f32 %v36_v1, %v36_v1  ;;  %278 = vmatpush3.xpose.msra.mxu0 %v36_v1  ;;  %344 = vmatprep.mubr.msk.f32.mxu1 %vm380_vm0, %v379_v4  ;;  %v132_v6 = vmul.f32 %v35_v2, %v35_v2  ;;  %v34_v7 = vld [vmem:[%s496_s1 + $0x68] sm:$0xff] }
   0x3   :  { %279 = vmatprep.subr.mxu0 %v379_v4  ;;  %309 = vmatprep.mubr.msk.f32.mxu0 %vm380_vm0, %v379_v4 }
   0x4   :  { %112 = vadd.xlane.f32.xlu0 %v111_v3  ;;  %313 = vmatpush3.xpose.msra.mxu1 %v133_v5 }
   0x5   :  { %314 = vmatprep.subr.mxu1 %v379_v4 }
   0x6   :  { %7 = vsyncpa [#allocation6], 0  ;;  %280 = vmatpush3.xpose.msra.mxu0 %v35_v2  ;;  %v131_v8 = vmul.f32 %v34_v7, %v34_v7  ;;  %v33_v9 = vld [vmem:[%s496_s1 + $0x60] sm:$0xff]  ;;  %v32_v11 = vld [vmem:[%s496_s1 + $0x58] sm:$0xff]  ;;  %v381_v14 = vmov 0   ;;  %v382_v36 = vmov 1.0   ;;  %v223_v50 = vlaneseq }
   0x7   :  { %281 = vmatprep.subr.mxu0 %v379_v4  ;;  %v130_v10 = vmul.f32 %v33_v9, %v33_v9  ;;  %v129_v12 = vmul.f32 %v32_v11, %v32_v11  ;;  %v31_v13 = vld [vmem:[%s496_s1 + $0x50] sm:$0xff]  ;;  %352 = vset.pattern.permute.xlu0 %v381_v14  ;;  %v30_v16 = vld [vmem:[%s496_s1 + $0x48] sm:$0xff]  ;;  %v29_v18 = vld [vmem:[%s496_s1 + $0x40] sm:$0xff] }
   0x8   :  { %315 = vmatpush3.xpose.msra.mxu1 %v132_v6  ;;  %v128_v15 = vmul.f32 %v31_v13, %v31_v13  ;;  %v127_v17 = vmul.f32 %v30_v16, %v30_v16  ;;  %v126_v19 = vmul.f32 %v29_v18, %v29_v18  ;;  %v28_v20 = vld [vmem:[%s496_s1 + $0x38] sm:$0xff]  ;;  %v27_v22 = vld [vmem:[%s496_s1 + $0x30] sm:$0xff]  ;;  %v26_v24 = vld [vmem:[%s496_s1 + $0x28] sm:$0xff]  ;;  %v224_v51 = vshrl.u32 %v223_v50, 7 }
   0x9   :  { %316 = vmatprep.subr.mxu1 %v379_v4  ;;  %v125_v21 = vmul.f32 %v28_v20, %v28_v20  ;;  %v124_v23 = vmul.f32 %v27_v22, %v27_v22  ;;  %v123_v25 = vmul.f32 %v26_v24, %v26_v24  ;;  %v25_v26 = vld [vmem:[%s496_s1 + $0x20] sm:$0xff]  ;;  %v24_v28 = vld [vmem:[%s496_s1 + $0x18] sm:$0xff]  ;;  %v23_v30 = vld [vmem:[%s496_s1 + $0x10] sm:$0xff] }
   0xa   :  { %282 = vmatpush3.xpose.msra.mxu0 %v34_v7  ;;  %v122_v27 = vmul.f32 %v25_v26, %v25_v26  ;;  %v121_v29 = vmul.f32 %v24_v28, %v24_v28  ;;  %v120_v31 = vmul.f32 %v23_v30, %v23_v30  ;;  %v22_v32 = vld [vmem:[%s496_s1 + $0x8] sm:$0xff]  ;;  %v21_v34 = vld [vmem:[%s496_s1] sm:$0xff]  ;;  %v225_v52 = vsub.s32 0, %v224_v51  ;;  %s383_s1 = smov [#allocation5]  }
   0xb   :  { %283 = vmatprep.subr.mxu0 %v379_v4  ;;  %v119_v33 = vmul.f32 %v22_v32, %v22_v32  ;;  %v118_v35 = vmul.f32 %v21_v34, %v21_v34  ;;  %v110_v37 = vld [vmem:[#allocation3] sm:$0xff]  ;;  %s235_s14 = sshll.u32 %s383_s1, 4  ;;  %s236_s14 = int_to_ptr.vmem [resolvable:$true] %s235_s14 }
   0xc   :  { %317 = vmatpush3.xpose.msra.mxu1 %v131_v8  ;;  %s357_s0 = scalar_lea.vmem %s236_s14, 128  ;;  %p362_p1 = scmp.lt.s32.totalorder %s236_s14, %s236_s14 }
   0xd   :  { %318 = vmatprep.subr.mxu1 %v379_v4  ;;  %p358_p0 = scmp.ne.s32.totalorder %s236_s14, %s357_s0  ;;  %p363_p2 = scmp.lt.s32.totalorder %s357_s0, %s357_s0 }
   0xe   :  { %284 = vmatpush3.xpose.msra.mxu0 %v33_v9 }
   0xf   :  { %285 = vmatprep.subr.mxu0 %v379_v4  ;;  %p364_p3 = por %p363_p2, %p362_p1 }
  0x10   :  { %319 = vmatpush3.xpose.msra.mxu1 %v130_v10 }
  0x11   :  { %320 = vmatprep.subr.mxu1 %v379_v4  ;;  %p365_p4 = pnand %p364_p3, %p358_p0 }
  0x12   :  { %286 = vmatpush3.xpose.msra.mxu0 %v32_v11 }
  0x13   :  { %287 = vmatprep.subr.mxu0 %v379_v4 }
  0x14   :  { %321 = vmatpush3.xpose.msra.mxu1 %v129_v12 }
  0x15   :  { %322 = vmatprep.subr.mxu1 %v379_v4 }
  0x16   :  { %288 = vmatpush3.xpose.msra.mxu0 %v31_v13 }
  0x17   :  { %289 = vmatprep.subr.mxu0 %v379_v4 }
  0x18   :  { %323 = vmatpush3.xpose.msra.mxu1 %v128_v15 }
  0x19   :  { %324 = vmatprep.subr.mxu1 %v379_v4 }
  0x1a   :  { %290 = vmatpush3.xpose.msra.mxu0 %v30_v16 }
  0x1b   :  { %291 = vmatprep.subr.mxu0 %v379_v4 }
  0x1c   :  { %325 = vmatpush3.xpose.msra.mxu1 %v127_v17 }
  0x1d   :  { %326 = vmatprep.subr.mxu1 %v379_v4 }
  0x1e   :  { %292 = vmatpush3.xpose.msra.mxu0 %v29_v18 }
  0x1f   :  { %293 = vmatprep.subr.mxu0 %v379_v4 }
  0x20   :  { %327 = vmatpush3.xpose.msra.mxu1 %v126_v19 }
  0x21   :  { %328 = vmatprep.subr.mxu1 %v379_v4 }
  0x22   :  { %294 = vmatpush3.xpose.msra.mxu0 %v28_v20 }
  0x23   :  { %295 = vmatprep.subr.mxu0 %v379_v4 }
  0x24   :  { %329 = vmatpush3.xpose.msra.mxu1 %v125_v21 }
  0x25   :  { %330 = vmatprep.subr.mxu1 %v379_v4 }
  0x26   :  { %296 = vmatpush3.xpose.msra.mxu0 %v27_v22 }
  0x27   :  { %297 = vmatprep.subr.mxu0 %v379_v4 }
  0x28   :  { %331 = vmatpush3.xpose.msra.mxu1 %v124_v23 }
  0x29   :  { %332 = vmatprep.subr.mxu1 %v379_v4 }
  0x2a   :  { %298 = vmatpush3.xpose.msra.mxu0 %v26_v24 }
  0x2b   :  { %299 = vmatprep.subr.mxu0 %v379_v4 }
  0x2c   :  { %333 = vmatpush3.xpose.msra.mxu1 %v123_v25 }
  0x2d   :  { %334 = vmatprep.subr.mxu1 %v379_v4 }
  0x2e   :  { %300 = vmatpush3.xpose.msra.mxu0 %v25_v26 }
  0x2f   :  { %301 = vmatprep.subr.mxu0 %v379_v4 }
  0x30   :  { %335 = vmatpush3.xpose.msra.mxu1 %v122_v27 }
  0x31   :  { %336 = vmatprep.subr.mxu1 %v379_v4 }
  0x32   :  { %302 = vmatpush3.xpose.msra.mxu0 %v24_v28 }
  0x33   :  { %303 = vmatprep.subr.mxu0 %v379_v4 }
  0x34   :  { %337 = vmatpush3.xpose.msra.mxu1 %v121_v29 }
  0x35   :  { %338 = vmatprep.subr.mxu1 %v379_v4 }
  0x36   :  { %304 = vmatpush3.xpose.msra.mxu0 %v23_v30 }
  0x37   :  { %305 = vmatprep.subr.mxu0 %v379_v4 }
  0x38   :  { %339 = vmatpush3.xpose.msra.mxu1 %v120_v31 }
  0x39   :  { %340 = vmatprep.subr.mxu1 %v379_v4 }
  0x3a   :  { %306 = vmatpush3.xpose.msra.mxu0 %v22_v32 }
  0x3b   :  { %307 = vmatprep.subr.mxu0 %v379_v4 }
  0x3c   :  { %341 = vmatpush3.xpose.msra.mxu1 %v119_v33 }
  0x3d   :  { %342 = vmatprep.subr.mxu1 %v379_v4 }
  0x3e   :  { %308 = vmatpush3.xpose.msra.mxu0 %v21_v34 }
  0x40   :  { %343 = vmatpush3.xpose.msra.mxu1 %v118_v35 }
  0x41   :  { %310 = vmatmul.mubr.f32.vlgmr.msra.gmra.mxu0 %v402_v0 }
  0x43   :  { %345 = vmatmul.mubr.f32.vlgmr.msra.gmra.mxu1 %v382_v36 }
  0x8d   :  { %v113_v38 = vpop.xlane.xlu0 %112 }
  0x8e   :  { %v114_v39 = vadd.f32 %v113_v38, %v110_v37 }
  0x90   :  { %116 = vst.msk [vmem:[#allocation3] sm:$0xff] %vm17_vm1, %v114_v39 }
  0x97   :  { %v209_v40 = vld [vmem:[#allocation3] sm:$0xff] }
  0x98   :  { %v210_v41 = vmax.f32 %v209_v40, 1e-24 }
  0x9a   :  { %353 = vrsqrt.f32 %v210_v41 }
  0xa7   :  { %v354_v42 = vpop.eup %353 }
  0xa8   :  { %v216_v43 = vmul.f32 20.0, %v354_v42 }
  0xaa   :  { %219 = vperm.xlu0 %352, %v216_v43  }
 0x101   :  { %v104_v44 = vpop.f32.mrf.mxu0 }
 0x103   :  { %v200_v45 = vpop.f32.mrf.mxu1  ;;  %v311_v46 = vpop.f32.mrf.mxu0 }
 0x104   :  { %205 = vst [vmem:[#allocation4] sm:$0xff] %v200_v45 }
 0x105   :  { %v346_v47 = vpop.f32.mrf.mxu1 }
 0x10b   :  { %v212_v48 = vld [vmem:[#allocation4] sm:$0x1] }
 0x10c   :  { %v213_v49 = vmax.f32 %v212_v48, 1e-24 }
 0x10e   :  { %355 = vrsqrt.f32 %v213_v49 }
 0x11b   :  { %v356_v53 = vpop.eup %355 }
 0x11c   :  { %v226_v54 = vrot.slane %v356_v53, %v225_v52 }
 0x125   :  { %v220_v55 = vpop.permute.xlu0 %219 }
 0x126   :  { %v222_v56 = vmul.f32 %v220_v55, %v104_v44 }
 0x128   :  { %v227_v57 = vmul.f32 %v226_v54, %v222_v56 }
 0x12a   :  { %228 = vst [vmem:[#allocation5] sm:$0xff] %v227_v57 }
 0x12b   :  { %368 = shalt.err (!%p365_p4)
}
 0x12c   :  { %238 = dma.vmem_to_hbm [thread:$0]  %s236_s14, 128, %s497_s2, [#allocation6]  }
 0x12d   :  { %377 = dma.done.wait [#allocation6], 128  }
 0x12e   :  { %378 = vsyncadd [#allocation6], 4294967168 }
 0x12f   :  { %242 = vsyncpa [#allocation6], 1 }

</bundles_post_ra>
